<compile_context>
chip_gen: v7x
topology: tpu7x:2x2x1
jax: 0.10.0
libtpu: 0.0.40
codegen_flags: <defaults>
</compile_context>

<pallas_src>
import math
from collections import Counter

import numpy as np
import jax
import jax.numpy as jnp
from jax.experimental import pallas as pl
from jax.experimental.pallas import tpu as pltpu


# ----------------------------------------------------------------------------
# Kernel bodies (pure jnp -> run on TPU hardware and in interpret mode)
# ----------------------------------------------------------------------------
def _dp_row_scatter_kernel(rows_ref, scale_ref, noise_ref, x_ref, o_ref):
    # rows_ref lives in SMEM and is consumed by the index_maps (gather/scatter).
    del rows_ref
    # x_ref / noise_ref / o_ref: (1, 1, D);  scale_ref: (1, 1, 1)
    x = x_ref[...].astype(jnp.float32)          # no-op cast when already f32
    o_ref[...] = (x + scale_ref[...] * noise_ref[...]).astype(o_ref.dtype)


def _dp_row_add_kernel(scale_ref, noise_ref, x_ref, o_ref):
    # scale_ref: (TM, 1) broadcast across the 128-lane (D) axis in-register.
    x = x_ref[...].astype(jnp.float32)
    o_ref[...] = (x + scale_ref[...] * noise_ref[...]).astype(o_ref.dtype)


# ----------------------------------------------------------------------------
# Primary path: touched-rows-only gather/scatter kernel
# ----------------------------------------------------------------------------
def dp_agg_scatter(loc_emb: jax.Array, rows: jax.Array, scales: jax.Array,
                   noise: jax.Array) -> jax.Array:
    """out[rows[k]] = loc_emb[rows[k]] + scales[k] * noise[k]; other rows unchanged.

    loc_emb: [N, D], rows: [K] int32 (unique), scales: [K] f32, noise: [K, D] f32.
    """
    N, D = loc_emb.shape
    K = rows.shape[0]

    # 3-D views so every BlockSpec's last two dims equal the full array dims
    # (keeps Mosaic's (8,128) tiling rules trivially satisfied for 1-row blocks
    # and keeps the stores lane-dense along D).
    x3 = loc_emb.reshape(N, 1, D)
    noise3 = noise.reshape(K, 1, D)
    scale3 = scales.reshape(K, 1, 1)

    out3 = pl.pallas_call(
        _dp_row_scatter_kernel,
        out_shape=jax.ShapeDtypeStruct((N, 1, D), loc_emb.dtype),
        grid_spec=pltpu.PrefetchScalarGridSpec(
            num_scalar_prefetch=1,        # `rows` -> SMEM, visible to index_maps
            grid=(K,),                    # one touched row per grid step
            in_specs=[
                pl.BlockSpec((1, 1, 1), lambda i, rows_ref: (i, 0, 0)),           # scale
                pl.BlockSpec((1, 1, D), lambda i, rows_ref: (i, 0, 0)),           # noise
                pl.BlockSpec((1, 1, D), lambda i, rows_ref: (rows_ref[i], 0, 0)), # gather
            ],
            out_specs=pl.BlockSpec((1, 1, D), lambda i, rows_ref: (rows_ref[i], 0, 0)),
        ),
        # loc_emb (arg index 3, counting the scalar-prefetch operand) aliases
        # output 0: untouched rows are never read nor written by the kernel.
        input_output_aliases={3: 0},
        # Data-dependent scatter rows and K is small; keep the axis "arbitrary".
        compiler_params=pltpu.CompilerParams(dimension_semantics=("arbitrary",)),
    )(rows, scale3, noise3, x3)
    return out3.reshape(N, D)


# ----------------------------------------------------------------------------
# Fallback path: row-tiled, double-buffered full-table kernel
# ----------------------------------------------------------------------------
def dp_agg_tiled(loc_emb: jax.Array, row_scale: jax.Array, noise: jax.Array,
                 *, tm: int = 256) -> jax.Array:
    """out[r] = loc_emb[r] + row_scale[r, 0] * noise[r] for every row.

    loc_emb/noise: [N, D], row_scale: [N, 1] (zero for rows without noise).
    """
    N, D = loc_emb.shape
    tm = max(8, min(int(tm), 512))
    tm -= tm % 8                                   # sublane-aligned row tile
    pad = (-N) % tm
    if pad:
        loc_emb = jnp.pad(loc_emb, ((0, pad), (0, 0)))
        row_scale = jnp.pad(row_scale, ((0, pad), (0, 0)))
        noise = jnp.pad(noise, ((0, pad), (0, 0)))
    npad = N + pad

    out = pl.pallas_call(
        _dp_row_add_kernel,
        out_shape=jax.ShapeDtypeStruct((npad, D), loc_emb.dtype),
        grid=(npad // tm,),
        in_specs=[
            pl.BlockSpec((tm, 1), lambda i: (i, 0)),   # per-row sigma
            pl.BlockSpec((tm, D), lambda i: (i, 0)),   # noise
            pl.BlockSpec((tm, D), lambda i: (i, 0)),   # embeddings
        ],
        out_specs=pl.BlockSpec((tm, D), lambda i: (i, 0)),
        input_output_aliases={2: 0},                   # in-place table update
        compiler_params=pltpu.CompilerParams(
            dimension_semantics=("parallel",),         # megacore split on v7x
            vmem_limit_bytes=32 * 1024 * 1024,
        ),
    )(row_scale, noise, loc_emb)
    return out[:N] if pad else out


# ----------------------------------------------------------------------------
# Host-side glue (mirrors the reference's dict / Counter bookkeeping)
# ----------------------------------------------------------------------------
def _touched_rows_and_scales(fake_loc, real_loc, eps, delt, clip):
    edge_cnt = Counter()
    for real in real_loc.values():
        edge_cnt.update(list(real))
    for fake in fake_loc.values():
        edge_cnt.update(list(fake))
    sigmod = clip * math.sqrt(2.0 * math.log(1.25 / delt)) / eps
    rows = np.array(sorted(edge_cnt), dtype=np.int32)
    if rows.size == 0:
        return rows, np.zeros((0,), dtype=np.float32)
    cnts = np.array([edge_cnt[int(r)] for r in rows], dtype=np.float32)
    scales = (sigmod / np.sqrt(cnts)).astype(np.float32)
    return rows, scales


class DpAgg:
    """Pallas/TPU port of Dp_Agg.forward (DP Gaussian-noise aggregation)."""

    def __init__(self, eps, delt, clip):
        self.eps = eps
        self.delt = delt
        self.clip = clip

    def __call__(self, loc_emb, fake_loc, real_loc, *, key=None,
                 dense_threshold=0.5):
        N, D = loc_emb.shape
        rows, scales = _touched_rows_and_scales(
            fake_loc, real_loc, self.eps, self.delt, self.clip)
        K = int(rows.shape[0])
        if K == 0:
            return loc_emb
        if key is None:
            key = jax.random.PRNGKey(0)

        if K <= dense_threshold * N:
            # Sparse path: gather/scatter only the K touched rows in-kernel.
            noise = jax.random.normal(key, (K, D), dtype=jnp.float32)
            return dp_agg_scatter(loc_emb, jnp.asarray(rows),
                                  jnp.asarray(scales), noise)

        # Dense path: most rows get noise anyway -> stream the table once.
        noise = jax.random.normal(key, (N, D), dtype=jnp.float32)
        full_scale = np.zeros((N, 1), dtype=np.float32)
        full_scale[rows, 0] = scales
        return dp_agg_tiled(loc_emb, jnp.asarray(full_scale), noise)


# ----------------------------------------------------------------------------
# Self-test
# ----------------------------------------------------------------------------
if __name__ == "__main__":
    key = jax.random.PRNGKey(0)
    k_emb, k_noise = jax.random.split(key)

    N, D = 64, 128  # 64 locations, 128-dim (lane-dense) embeddings
    loc_emb = jax.random.normal(k_emb, (N, D), dtype=jnp.float32)

    real_loc = {0: [0, 1, 2, 3], 1: [2, 3, 7]}
    fake_loc = {0: [4, 5], 1: [1, 5, 9]}

    module = DpAgg(eps=1.0, delt=1e-5, clip=1.0)
    out = jax.block_until_ready(module(loc_emb, fake_loc, real_loc, key=k_noise))

    # Pure-numpy reference using the exact same noise realization.
    rows, scales = _touched_rows_and_scales(fake_loc, real_loc, 1.0, 1e-5, 1.0)
    noise = np.asarray(jax.random.normal(k_noise, (rows.shape[0], D),
                                         dtype=jnp.float32))
    expected = np.asarray(loc_emb).copy()
    expected[rows] += scales[:, None] * noise

    assert out.shape == (N, D) and out.dtype == loc_emb.dtype
    np.testing.assert_allclose(np.asarray(out), expected, rtol=1e-5, atol=1e-5)

    # Untouched rows must pass through unchanged (aliasing guarantee).
    untouched = np.setdiff1d(np.arange(N), rows)
    assert np.allclose(np.asarray(out)[untouched], np.asarray(loc_emb)[untouched])

    # Also exercise the dense row-tiled fallback kernel (multi-step grid).
    full_scale = np.zeros((N, 1), dtype=np.float32)
    full_scale[rows, 0] = scales
    full_noise = jax.random.normal(k_noise, (N, D), dtype=jnp.float32)
    out_dense = jax.block_until_ready(
        dp_agg_tiled(loc_emb, jnp.asarray(full_scale), full_noise, tm=16))
    expected_dense = np.asarray(loc_emb) + full_scale * np.asarray(full_noise)
    np.testing.assert_allclose(np.asarray(out_dense), expected_dense,
                               rtol=1e-5, atol=1e-5)

    print("KERNEL_OK")
</pallas_src>

<mosaic_0001>
module attributes {stable_mosaic.version = 11 : i64} {
  func.func @_dp_row_scatter_kernel(%arg0: i32, %arg1: memref<8xi32, #tpu.memory_space<smem>>, %arg2: memref<1x1x1xf32, #tpu.memory_space<vmem>>, %arg3: memref<1x1x128xf32, #tpu.memory_space<vmem>>, %arg4: memref<1x1x128xf32, #tpu.memory_space<vmem>>, %arg5: memref<1x1x128xf32, #tpu.memory_space<vmem>>) attributes {dimension_semantics = [#tpu.dimension_semantics<arbitrary>], iteration_bounds = array<i64: 8>, scalar_prefetch = 1 : i64, scratch_operands = 0 : i64, tpu.core_type = #tpu.core_type<tc>, window_params = [{transform_indices = @transform_0, window_bounds = array<i64: 1, 1, 1>}, {transform_indices = @transform_1, window_bounds = array<i64: 1, 1, 128>}, {transform_indices = @transform_2, window_bounds = array<i64: 1, 1, 128>}, {transform_indices = @transform_3, window_bounds = array<i64: 1, 1, 128>}]} {
    %c0 = arith.constant 0 : index
    %c0_0 = arith.constant 0 : index
    %c0_1 = arith.constant 0 : index
    %0 = vector.load %arg4[%c0, %c0_0, %c0_1] : memref<1x1x128xf32, #tpu.memory_space<vmem>>, vector<1x1x128xf32>
    %c0_2 = arith.constant 0 : index
    %c0_3 = arith.constant 0 : index
    %c0_4 = arith.constant 0 : index
    %1 = vector.load %arg2[%c0_2, %c0_3, %c0_4] : memref<1x1x1xf32, #tpu.memory_space<vmem>>, vector<1x1x1xf32>
    %c0_5 = arith.constant 0 : index
    %c0_6 = arith.constant 0 : index
    %c0_7 = arith.constant 0 : index
    %2 = vector.load %arg3[%c0_5, %c0_6, %c0_7] : memref<1x1x128xf32, #tpu.memory_space<vmem>>, vector<1x1x128xf32>
    %3 = vector.broadcast %1 : vector<1x1x1xf32> to vector<1x1x128xf32>
    %4 = arith.mulf %3, %2 : vector<1x1x128xf32>
    %5 = arith.addf %0, %4 : vector<1x1x128xf32>
    %c0_8 = arith.constant 0 : index
    %c0_9 = arith.constant 0 : index
    %c0_10 = arith.constant 0 : index
    %6 = vector.load %arg5[%c0_8, %c0_9, %c0_10] : memref<1x1x128xf32, #tpu.memory_space<vmem>>, vector<1x1x128xf32>
    tpu.vector_store %arg5[%c0_8, %c0_9, %c0_10], %5 {strides = array<i32>} : memref<1x1x128xf32, #tpu.memory_space<vmem>>, vector<1x1x128xf32>,
    return
  }
  func.func @transform_0(%arg0: i32, %arg1: memref<8xi32, #tpu.memory_space<smem>>) -> (i32, i32, i32) {
    %c0_i32 = arith.constant 0 : i32
    %c0_i32_0 = arith.constant 0 : i32
    %c0_i32_1 = arith.constant 0 : i32
    return %arg0, %c0_i32, %c0_i32_0 : i32, i32, i32
  }
  func.func @transform_1(%arg0: i32, %arg1: memref<8xi32, #tpu.memory_space<smem>>) -> (i32, i32, i32) {
    %c0_i32 = arith.constant 0 : i32
    %c0_i32_0 = arith.constant 0 : i32
    %c0_i32_1 = arith.constant 0 : i32
    return %arg0, %c0_i32, %c0_i32_0 : i32, i32, i32
  }
  func.func @transform_2(%arg0: i32, %arg1: memref<8xi32, #tpu.memory_space<smem>>) -> (i32, i32, i32) {
    %0 = arith.index_cast %arg0 : i32 to index
    %1 = memref.load %arg1[%0] : memref<8xi32, #tpu.memory_space<smem>>
    %c0_i32 = arith.constant 0 : i32
    %c0_i32_0 = arith.constant 0 : i32
    %c0_i32_1 = arith.constant 0 : i32
    return %1, %c0_i32, %c0_i32_0 : i32, i32, i32
  }
  func.func @transform_3(%arg0: i32, %arg1: memref<8xi32, #tpu.memory_space<smem>>) -> (i32, i32, i32) {
    %0 = arith.index_cast %arg0 : i32 to index
    %1 = memref.load %arg1[%0] : memref<8xi32, #tpu.memory_space<smem>>
    %c0_i32 = arith.constant 0 : i32
    %c0_i32_0 = arith.constant 0 : i32
    %c0_i32_1 = arith.constant 0 : i32
    return %1, %c0_i32, %c0_i32_0 : i32, i32, i32
  }
}

</mosaic_0001>

<bundles_post_ra>
// kernel: tpu_custom_call.1
= control target key start
LH: loop header
LB: loop body
LE: loop exit
PB: predicated region body
PF: predicated region fallthrough
CT: control target
= control target key end

     0   :  { %s793_s0 = inlined_call_operand.vmem [shape: s32[8], index: 0, kind: input, shape index: {}]   ;;  %s794_s1 = inlined_call_operand.vmem [shape: f32[8,1,1], index: 1, kind: input, shape index: {}]   ;;  %s795_s2 = inlined_call_operand.vmem [shape: f32[8,1,128], index: 2, kind: input, shape index: {}]   ;;  %s796_s3 = inlined_call_operand.hbm [shape: f32[64,1,128], index: 3, kind: input, shape index: {}, may-alias: {3,4}]   ;;  %s797_s4 = inlined_call_operand.hbm [shape: f32[64,1,128], index: 4, kind: output, shape index: {}, may-alias: {3,4}]  }
   0x1   :  { %s9_s17 = sshll.u32 %s793_s0, 4  ;;  %s10_s17 = int_to_ptr.vmem [resolvable:$true] %s9_s17 }
   0x2   :  { %s421_s18 = scalar_lea.vmem %s10_s17, 16  ;;  %p426_p1 = scmp.lt.s32.totalorder %s10_s17, %s10_s17 }
   0x3   :  { %p422_p0 = scmp.ne.s32.totalorder %s10_s17, %s421_s18  ;;  %p427_p2 = scmp.lt.s32.totalorder %s421_s18, %s421_s18 }
   0x5   :  { %p428_p3 = por %p427_p2, %p426_p1 }
   0x7   :  { %p429_p4 = pnand %p428_p3, %p422_p0 }
   0x9   :  { %432 = shalt.err (!%p429_p4)  }
   0xa   :  { %s557_s19 = smov [#allocation3]  }
   0xb   :  { %12 = dma.vmem_to_smem %s10_s17, 16, %s557_s19, [#allocation2] }
   0xc   :  { %519 = dma.done.wait [#allocation2], 16 }
   0xd   :  { %520 = vsyncadd [#allocation2], 4294967280 }
   0xe   :  { %14 = sfence }
   0xf   :  { %15 = vsyncpa [#allocation5], 0 }
  0x10   :  { %17 = vsyncpa [#allocation5 + $0x1], 0 }
  0x11   :  { %18 = vsyncpa [#allocation6], 0 }
  0x12   :  { %20 = vsyncpa [#allocation6 + $0x1], 0  ;;  %s589_s20 = smov 0   ;;  %s591_s0 = smov 0  }
  0x13   :  { %s593_s21 = smov 0   ;;  %s595_s22 = smov 0  }
  0x14   :  { %s597_s23 = smov 0   ;;  %s599_s24 = smov 0  }
  0x15   :  { %s601_s25 = smov 0  }
  0x16 LB: > { %s623_s26 = sadd.s32 4294967295, %s555_s25   ;;  %s334_s27 = sadd.s32 4294967294, %s555_s25   ;;  %s555_s25 = sphi %s601_s25, %s815_s25   ;;  %s551_s24 = sphi %s599_s24, %s814_s24   ;;  %s547_s23 = sphi %s597_s23, %s813_s23   ;;  %s543_s22 = sphi %s595_s22, %s812_s22   ;;  %s539_s21 = sphi %s593_s21, %s811_s21   ;;  %s535_s0 = sphi %s591_s0, %s810_s0   ;;  %s531_s20 = sphi %s589_s20, %s809_s20  }
  0x17   : > { %s627_s28 = sadd.s32 1, %s555_s25   ;;  %s82_s29 = sld [smem:[#allocation3 + %s555_s25]] }
  0x18   : > { %s83_s30 = sld [smem:[#allocation3 + %s627_s28]]  ;;  %s87_s5 = sadd.s32 1, %s551_s24 }
  0x19   : > { %p94_p5 = scmp.ne.s32.totalorder %s551_s24, %s547_s23  ;;  %p95_p6 = scmp.eq.s32.totalorder %s555_s25, 0 }
  0x1a   : > { %p100_p7 = scmp.ne.s32.totalorder %s547_s23, %s543_s22  ;;  %p101_p8 = scmp.eq.s32.totalorder %s623_s26, 0 }
  0x1b   : > { %p637_p9 = por %p95_p6, %p94_p5  ;;  %s110_s7 = sld [smem:[#allocation3 + %s555_s25]] }
  0x1c   : > { %p642_p10 = por %p101_p8, %p100_p7  ;;  %s111_s9 = sld [smem:[#allocation3 + %s627_s28]] }
  0x1d   : > { %s115_s10 = sadd.s32 1, %s539_s21  ;;  %p125_p11 = scmp.ne.s32.totalorder %s539_s21, %s535_s0 }
  0x1e   : > { %s801_s8 = scalar_select %p642_p10, 1, 0 }
  0x1f   : > { %s84_s11 = ssub.s32 %s82_s29, %s83_s30  ;;  %p126_p12 = scmp.eq.s32.totalorder %s623_s26, 7 }
  0x20   : > { %p85_p13 = scmp.eq.s32.totalorder %s84_s11, 0  ;;  %p131_p0 = scmp.ne.s32.totalorder %s535_s0, %s531_s20 }
  0x21   : > { %p653_p1 = por %p126_p12, %p125_p11  ;;  %p132_p2 = scmp.eq.s32.totalorder %s334_s27, 7 }
  0x22   : > { %s658_s13 = scalar_select %p85_p13, %s551_s24, %s87_s5  }
  0x23   : > { %s802_s12 = scalar_select %p653_p1, 1, 0 }
  0x24   : > { %s112_s14 = ssub.s32 %s110_s7, %s111_s9  ;;  %p660_p3 = por %p132_p2, %p131_p0 }
  0x25   : > { %p113_p4 = scmp.eq.s32.totalorder %s112_s14, 0  ;;  %p360_p5 = scmp.lt.s32.totalorder %s555_s25, 8 }
  0x26   : > { %s803_s15 = scalar_select %p660_p3, 1, 0 }
  0x27   : > { %s666_s16 = scalar_select %p113_p4, %s539_s21, %s115_s10  }
  0x28   : > { %s164_s17 = sand.u32 1, %s551_s24   ;;  %p676_p6 = pnand %p360_p5, %p637_p9 }
  0x29   : > { %s342_s18 = scalar_select %p637_p9, [#allocation3], [#allocation8] }
  0x2a   : > { %s343_s19 = scalar_select %p637_p9, %s555_s25, 0 }
  0x2b   : > { %s817_s18 = smov (!%p360_p5, %s342_s18), [#allocation10]  ;;  %p338_p7 = scmp.ge.s32.totalorder %s555_s25, 1 }
  0x2c   : > { %s819_s19 = smov (!%p360_p5, %s343_s19), 0  ;;  %s167_s29 = scalar_lea.vmem [#allocation4], %s164_s17 }
  0x2d   : > { %s168_s27 = sld [smem:[%s817_s18 + %s819_s19]]  ;;  %s175_s30 = sshll.u32 %s167_s29, 4  ;;  %s686_s30 = int_to_ptr.vmem [resolvable:$true] %s175_s30 }
  0x2e   : > { %p180_p8 = scmp.lt.s32.totalorder %s555_s25, 9  ;;  %s165_s11 = scalar_lea.sflag [#allocation5], %s164_s17 }
  0x2f   : > { %p435_p12 = pneg %p676_p6 }
  0x30   : > { %p682_p11 = pnand %p338_p7, %p180_p8 }
  0x33   : > { %s337_s7 = sshll.u32 %s168_s27, 4  ;;  %s438_s27 = scalar_lea.hbm %s796_s3, 1024 }
  0x34   : > { %s691_s10 = scalar_lea.hbm %s796_s3, %s337_s7 }
  0x35   : > { %s433_s14 = scalar_lea.hbm %s691_s10, 16  ;;  %p439_p2 = scmp.lt.u32.totalorder %s691_s10, %s796_s3 }
  0x36   : > { %p434_p9 = scmp.ne.s32.totalorder %s691_s10, %s433_s14  ;;  %p440_p4 = scmp.lt.u32.totalorder %s438_s27, %s433_s14 }
  0x37   : > { %p442_p7 = scmp.lt.u32.totalorder %s433_s14, %s691_s10 }
  0x38   : > { %p436_p13 = pnand %p435_p12, %p434_p9  ;;  %p441_p5 = por %p440_p4, %p439_p2 }
  0x3a   : > { %p437_p0 = pneg %p436_p13  ;;  %p443_p8 = por %p442_p7, %p441_p5 }
  0x3c   : > { %p444_p3 = pnand %p443_p8, %p437_p0 }
  0x3e   : > { %447 = shalt.err (!%p444_p3)
}
  0x3f   : > { %s448_s17 = scalar_lea.vmem %s686_s30, 16  ;;  %s558_s9 = smov [#allocation4]  }
  0x40   : > { %p449_p9 = scmp.ne.s32.totalorder %s686_s30, %s448_s17  ;;  %s453_s6 = sshll.u32 %s558_s9, 4  ;;  %s454_s6 = int_to_ptr.vmem [resolvable:$false] %s453_s6 }
  0x41   : > { %s455_s18 = scalar_lea.vmem %s454_s6, 32  ;;  %p456_p10 = scmp.lt.s32.totalorder %s686_s30, %s454_s6 }
  0x42   : > { %p451_p13 = pnand %p449_p9, %p435_p12  ;;  %p457_p2 = scmp.lt.s32.totalorder %s455_s18, %s448_s17 }
  0x44   : > { %p452_p1 = pneg %p451_p13  ;;  %p458_p4 = por %p457_p2, %p456_p10 }
  0x46   : > { %p459_p5 = pnand %p458_p4, %p452_p1 }
  0x48   : > { %462 = shalt.err (!%p459_p5)
}
  0x49   : > { %355 = dma.hbm_to_vmem [thread:$0]  (!%p676_p6), %s691_s10, 16, %s686_s30, %s165_s11  }
  0x4a   : > { %184 = sbr.rel (%p682_p11) target bundleno = 236 (0xec), region = 32  ;;  %s186_s14 = sand.u32 (!%p682_p11), 1, %s547_s23  }
  0x4b   : > { %s187_s19 = scalar_lea.sflag (!%p682_p11), [#allocation5], %s186_s14  ;;  %s189_s27 = scalar_lea.vmem (!%p682_p11), [#allocation4], %s186_s14 }
  0x4c   : > { %p806_p3 = scmp.ne.s32.totalorder (!%p682_p11), %s801_s8, 0 }
  0x51   : > { %522 = dma.done.wait (%p806_p3), %s187_s19, 16  }
  0x52   : > { %524 = vsyncadd (%p806_p3), %s187_s19, 4294967280  ;;  %p216_p10 = scmp.lt.s32.totalorder %s623_s26, 7  ;;  %v559_v0 = vmov 0   ;;  %v232_v2 = vlaneseq  ;;  %p807_p1 = scmp.ne.s32.totalorder %s802_s12, 0  ;;  %v224_v8 = vld [vmem:[%s189_s27] sm:$0x1] }
  0x53   : > { %420 = vset.pattern.permute.xlu0 %v559_v0  ;;  %s214_s29 = sand.u32 1, %s535_s0   ;;  %s560_s27 = smov [#allocation7]  }
  0x54   : > { %s217_s22 = scalar_select %p216_p10, %s623_s26, 7  ;;  %v233_v3 = vshrl.u32 %v232_v2, 7 }
  0x55   : > { %s346_s8 = scalar_select %p807_p1, [#allocation3], [#allocation9] }
  0x56   : > { %s218_s10 = scalar_lea.vmem %s794_s1, %s217_s22  ;;  %s821_s26 = smov (!%p807_p1, %s623_s26), 0  ;;  %v234_v4 = vsub.s32 0, %v233_v3 }
  0x57   : > { %v225_v1 = vld [vmem:[%s218_s10] sm:$0x1]  ;;  %s246_s11 = sld [smem:[%s346_s8 + %s821_s26]]  ;;  %s221_s9 = scalar_lea.vmem %s795_s2, %s217_s22 }
  0x58   : > { %229 = vperm.xlu0 %420, %v225_v1   ;;  %v226_v5 = vld [vmem:[%s221_s9] sm:$0x1]  ;;  %s215_s18 = scalar_lea.vmem [#allocation7], %s214_s29  ;;  %s240_s22 = scalar_lea.sflag [#allocation6], %s214_s29 }
  0x59   : > { %s253_s14 = sshll.u32 %s215_s18, 4  ;;  %s467_s10 = sshll.u32 %s560_s27, 4  ;;  %s744_s14 = int_to_ptr.vmem [resolvable:$true] %s253_s14  ;;  %s468_s10 = int_to_ptr.vmem [resolvable:$false] %s467_s10 }
  0x5a   : > { %s463_s5 = scalar_lea.vmem %s744_s14, 16  ;;  %s469_s8 = scalar_lea.vmem %s468_s10, 32 }
  0x5b   : > { %p464_p6 = scmp.ne.s32.totalorder %s744_s14, %s463_s5  ;;  %p470_p0 = scmp.lt.s32.totalorder %s744_s14, %s468_s10 }
  0x5c   : > { %p471_p7 = scmp.lt.s32.totalorder %s469_s8, %s463_s5 }
  0x5d   : > { %s339_s6 = sshll.u32 %s246_s11, 4  ;;  %p465_p11 = pnand %p464_p6, %p807_p1 }
  0x5e   : > { %s742_s26 = scalar_lea.hbm %s797_s4, %s339_s6  ;;  %p472_p8 = por %p471_p7, %p470_p0 }
  0x5f   : > { %p466_p12 = pneg %p465_p11 }
  0x61   : > { %p473_p9 = pnand %p472_p8, %p466_p12 }
  0xd7   : > { %v230_v6 = vpop.permute.xlu0 %229 }
  0xd8   : > { %v235_v7 = vrot.slane %v230_v6, %v234_v4 }
  0xda   : > { %v236_v9 = vmul.f32 %v235_v7, %v226_v5 }
  0xdc   : > { %v237_v10 = vadd.f32 %v236_v9, %v224_v8 }
  0xde   : > { %238 = vst [vmem:[%s215_s18] sm:$0x1] %v237_v10 }
  0xdf   : > { %476 = shalt.err (!%p473_p9)
}
  0xe0   : > { %s477_s11 = scalar_lea.hbm %s742_s26, 16  ;;  %s481_s17 = scalar_lea.hbm %s797_s4, 1024 }
  0xe1   : > { %p478_p13 = scmp.ne.s32.totalorder %s742_s26, %s477_s11  ;;  %p482_p5 = scmp.lt.u32.totalorder %s742_s26, %s797_s4 }
  0xe2   : > { %p483_p3 = scmp.lt.u32.totalorder %s481_s17, %s477_s11  ;;  %p485_p6 = scmp.lt.u32.totalorder %s477_s11, %s742_s26 }
  0xe3   : > { %p479_p2 = pnand %p478_p13, %p807_p1 }
  0xe4   : > { %p484_p10 = por %p483_p3, %p482_p5 }
  0xe5   : > { %p480_p4 = pneg %p479_p2 }
  0xe6   : > { %p486_p11 = por %p485_p6, %p484_p10 }
  0xe8   : > { %p487_p12 = pnand %p486_p11, %p480_p4 }
  0xea   : > { %490 = shalt.err (!%p487_p12)
}
  0xeb   : > { %348 = dma.vmem_to_hbm [thread:$0]  (%p807_p1), %s744_s14, 16, %s742_s26, %s240_s22  }
  0xec PF: > { %p361_p0 = scmp.ge.s32.totalorder %s555_s25, 2  ;;  %s265_s18 = sand.u32 1, %s531_s20  }
  0xed   : > { %p808_p7 = scmp.ne.s32.totalorder %s803_s15, 0  ;;  %s266_s19 = scalar_lea.sflag [#allocation6], %s265_s18 }
  0xef   : > { %p357_p8 = pnand %p361_p0, %p808_p7 }
  0xf1   : > { %526 = dma.done.wait (!%p357_p8), %s266_s19, 16  }
  0xf2   : > { %528 = vsyncadd (!%p357_p8), %s266_s19, 4294967280  ;;  %p23_p1 = scmp.ge.s32.totalorder %s627_s28, 10   ;;  %s809_s20 = smov %s535_s0 }
  0xf3   : > { %s810_s0 = smov %s539_s21  ;;  %s811_s21 = smov %s666_s16 }
  0xf4   : > { %s812_s22 = smov %s547_s23  ;;  %s813_s23 = smov %s551_s24 }
  0xf5   : > { %s814_s24 = smov %s658_s13  ;;  %s815_s25 = smov %s627_s28 }
  0xf6   :  { %25 = sbr.rel (!%p23_p1) target bundleno = 22 (0x16), region = 83 }
  0xfd   :  { %270 = vsyncpa [#allocation5], 1 }
  0xfe   :  { %272 = vsyncpa [#allocation5 + $0x1], 1 }
  0xff   :  { %273 = vsyncpa [#allocation6], 1 }
 0x100   :  { %275 = vsyncpa [#allocation6 + $0x1], 1 }

</bundles_post_ra>
